<compile_context>
chip_gen: v6e
topology: v6e:2x2x1
jax: 0.10.0
libtpu: 0.0.40
codegen_flags: <defaults>
</compile_context>

<pallas_src>
import functools

import jax
import jax.numpy as jnp
from jax.experimental import pallas as pl
from jax.experimental.pallas import tpu as pltpu

HIDDEN_DIM = 10
OUTPUT_DIM = 10
LANE = 128          # TPU lane width
SUBLANE = 8         # TPU sublane width
MAX_BLOCK_M = 512   # batch tile cap: safe on v7x (64 MiB VMEM), >85% roofline


def _round_up(n, m):
    return ((n + m - 1) // m) * m


def iris_mlp_kernel(x_ref, w1_ref, b1_ref, w2_ref, b2_ref, o_ref):
    # fc1: (TM, D_in_p) @ (D_in_p, H_p) + (1, H_p), then ReLU.
    h = jnp.dot(x_ref[...], w1_ref[...], preferred_element_type=jnp.float32)
    h = jnp.maximum(h + b1_ref[...], 0.0)
    # fc2: (TM, H_p) @ (H_p, O_p) + (1, O_p).
    y = jnp.dot(h, w2_ref[...], preferred_element_type=jnp.float32)
    o_ref[...] = (y + b2_ref[...]).astype(o_ref.dtype)


def prepare_params(w1, b1, w2, b2):
    """One-time param prep: transpose to (in, out) and zero-pad to 128 lanes.

    w1: (H, D_in), b1: (H,), w2: (O, H), b2: (O,) — PyTorch nn.Linear layout.
    Padding is all-zeros, which is correctness-preserving through ReLU.
    """
    in_dim = w1.shape[1]
    d_in = _round_up(in_dim, LANE)
    d_h = _round_up(HIDDEN_DIM, LANE)
    d_out = _round_up(OUTPUT_DIM, LANE)

    w1t = jnp.zeros((d_in, d_h), jnp.float32).at[:in_dim, :HIDDEN_DIM].set(w1.T)
    b1r = jnp.zeros((1, d_h), jnp.float32).at[0, :HIDDEN_DIM].set(b1)
    w2t = jnp.zeros((d_h, d_out), jnp.float32).at[:HIDDEN_DIM, :OUTPUT_DIM].set(w2.T)
    b2r = jnp.zeros((1, d_out), jnp.float32).at[0, :OUTPUT_DIM].set(b2)
    return w1t, b1r, w2t, b2r


@functools.partial(jax.jit, static_argnames=("block_m",))
def iris_model_forward(x, w1t, b1r, w2t, b2r, *, block_m=MAX_BLOCK_M):
    """x: (B, D_in) f32. w1t/b1r/w2t/b2r from prepare_params (pre-padded)."""
    B, in_dim = x.shape
    d_in, d_h = w1t.shape
    d_out = b2r.shape[1]

    # Batch tile: multiple of 8 sublanes, capped so double-buffered x/out tiles
    # plus resident weights fit VMEM on every generation (incl. v7x 64 MiB).
    tm = min(block_m, _round_up(B, SUBLANE))
    b_pad = _round_up(B, tm)

    # Zero-pad input rows (sliced away below) and feature lanes.
    xp = jnp.zeros((b_pad, d_in), x.dtype).at[:B, :in_dim].set(x)

    out_p = pl.pallas_call(
        iris_mlp_kernel,
        out_shape=jax.ShapeDtypeStruct((b_pad, d_out), x.dtype),
        grid=(b_pad // tm,),
        in_specs=[
            pl.BlockSpec((tm, d_in), lambda i: (i, 0)),    # x tile (pipelined)
            pl.BlockSpec((d_in, d_h), lambda i: (0, 0)),   # w1 (VMEM-resident)
            pl.BlockSpec((1, d_h), lambda i: (0, 0)),      # b1
            pl.BlockSpec((d_h, d_out), lambda i: (0, 0)),  # w2
            pl.BlockSpec((1, d_out), lambda i: (0, 0)),    # b2
        ],
        out_specs=pl.BlockSpec((tm, d_out), lambda i: (i, 0)),
        compiler_params=pltpu.CompilerParams(
            dimension_semantics=("parallel",)),            # megacore on v7x
    )(xp, w1t, b1r, w2t, b2r)

    # Slice back to the logical (B, OUTPUT_DIM) result.
    return out_p[:B, :OUTPUT_DIM]


def init_params(key, input_dim):
    # Deterministic init mimicking nn.Linear default: U(-1/sqrt(fan_in), ...).
    k1, k2, k3, k4 = jax.random.split(key, 4)
    lim1 = 1.0 / jnp.sqrt(jnp.float32(input_dim))
    lim2 = 1.0 / jnp.sqrt(jnp.float32(HIDDEN_DIM))
    w1 = jax.random.uniform(k1, (HIDDEN_DIM, input_dim), jnp.float32, -lim1, lim1)
    b1 = jax.random.uniform(k2, (HIDDEN_DIM,), jnp.float32, -lim1, lim1)
    w2 = jax.random.uniform(k3, (OUTPUT_DIM, HIDDEN_DIM), jnp.float32, -lim2, lim2)
    b2 = jax.random.uniform(k4, (OUTPUT_DIM,), jnp.float32, -lim2, lim2)
    return w1, b1, w2, b2


if __name__ == "__main__":
    key = jax.random.PRNGKey(0)
    k_x, k_p = jax.random.split(key)

    batch = 8
    input_dim = 4  # Iris features
    x = jax.random.normal(k_x, (batch, input_dim), jnp.float32)
    w1, b1, w2, b2 = init_params(k_p, input_dim)

    # Hoisted one-time param prep (transpose + pad to 128 lanes).
    w1t, b1r, w2t, b2r = prepare_params(w1, b1, w2, b2)

    out = iris_model_forward(x, w1t, b1r, w2t, b2r)
    out = jax.block_until_ready(out)

    # Reference check in plain JAX (same semantics as the PyTorch forward).
    ref = jnp.maximum(x @ w1.T + b1, 0.0) @ w2.T + b2
    assert out.shape == (batch, OUTPUT_DIM)
    assert jnp.allclose(out, ref, atol=1e-5, rtol=1e-5)

    # Also exercise a batch that spans multiple grid tiles / non-multiple of 8.
    x_big = jax.random.normal(k_x, (1037, input_dim), jnp.float32)
    out_big = jax.block_until_ready(
        iris_model_forward(x_big, w1t, b1r, w2t, b2r))
    ref_big = jnp.maximum(x_big @ w1.T + b1, 0.0) @ w2.T + b2
    assert out_big.shape == (1037, OUTPUT_DIM)
    assert jnp.allclose(out_big, ref_big, atol=1e-4, rtol=1e-4)

    print("KERNEL_OK")
</pallas_src>

<mosaic_0001>
module attributes {stable_mosaic.version = 11 : i64} {
  func.func @iris_mlp_kernel(%arg0: i32, %arg1: memref<8x128xf32, #tpu.memory_space<vmem>>, %arg2: memref<128x128xf32, #tpu.memory_space<vmem>>, %arg3: memref<1x128xf32, #tpu.memory_space<vmem>>, %arg4: memref<128x128xf32, #tpu.memory_space<vmem>>, %arg5: memref<1x128xf32, #tpu.memory_space<vmem>>, %arg6: memref<8x128xf32, #tpu.memory_space<vmem>>) attributes {dimension_semantics = [#tpu.dimension_semantics<parallel>], iteration_bounds = array<i64: 1>, scalar_prefetch = 0 : i64, scratch_operands = 0 : i64, tpu.core_type = #tpu.core_type<tc>, window_params = [{transform_indices = @transform_0, window_bounds = array<i64: 8, 128>}, {pipeline_mode = #tpu.pipeline_mode<synchronous>, transform_indices = @transform_1, window_bounds = array<i64: 128, 128>}, {pipeline_mode = #tpu.pipeline_mode<synchronous>, transform_indices = @transform_2, window_bounds = array<i64: 1, 128>}, {pipeline_mode = #tpu.pipeline_mode<synchronous>, transform_indices = @transform_3, window_bounds = array<i64: 128, 128>}, {pipeline_mode = #tpu.pipeline_mode<synchronous>, transform_indices = @transform_4, window_bounds = array<i64: 1, 128>}, {transform_indices = @transform_5, window_bounds = array<i64: 8, 128>}]} {
    %c0 = arith.constant 0 : index
    %c0_0 = arith.constant 0 : index
    %0 = vector.load %arg1[%c0, %c0_0] : memref<8x128xf32, #tpu.memory_space<vmem>>, vector<8x128xf32>
    %c0_1 = arith.constant 0 : index
    %c0_2 = arith.constant 0 : index
    %1 = vector.load %arg2[%c0_1, %c0_2] : memref<128x128xf32, #tpu.memory_space<vmem>>, vector<128x128xf32>
    %cst = arith.constant dense<0.000000e+00> : vector<8x128xf32>
    %2 = tpu.matmul %0, %1, %cst {dimension_numbers = #tpu.dot_dimension_numbers<[1], [0], [0], [1], [0, 0, 1, 1], [], []>} : vector<8x128xf32>, vector<128x128xf32>, vector<8x128xf32> -> vector<8x128xf32>
    %c0_3 = arith.constant 0 : index
    %c0_4 = arith.constant 0 : index
    %3 = vector.load %arg3[%c0_3, %c0_4] : memref<1x128xf32, #tpu.memory_space<vmem>>, vector<1x128xf32>
    %4 = vector.broadcast %3 : vector<1x128xf32> to vector<8x128xf32>
    %5 = arith.addf %2, %4 : vector<8x128xf32>
    %cst_5 = arith.constant 0.000000e+00 : f32
    %6 = vector.broadcast %cst_5 : f32 to vector<8x128xf32>
    %7 = arith.maximumf %5, %6 : vector<8x128xf32>
    %c0_6 = arith.constant 0 : index
    %c0_7 = arith.constant 0 : index
    %8 = vector.load %arg4[%c0_6, %c0_7] : memref<128x128xf32, #tpu.memory_space<vmem>>, vector<128x128xf32>
    %cst_8 = arith.constant dense<0.000000e+00> : vector<8x128xf32>
    %9 = tpu.matmul %7, %8, %cst_8 {dimension_numbers = #tpu.dot_dimension_numbers<[1], [0], [0], [1], [0, 0, 1, 1], [], []>} : vector<8x128xf32>, vector<128x128xf32>, vector<8x128xf32> -> vector<8x128xf32>
    %c0_9 = arith.constant 0 : index
    %c0_10 = arith.constant 0 : index
    %10 = vector.load %arg5[%c0_9, %c0_10] : memref<1x128xf32, #tpu.memory_space<vmem>>, vector<1x128xf32>
    %11 = vector.broadcast %10 : vector<1x128xf32> to vector<8x128xf32>
    %12 = arith.addf %9, %11 : vector<8x128xf32>
    %c0_11 = arith.constant 0 : index
    %c0_12 = arith.constant 0 : index
    %13 = vector.load %arg6[%c0_11, %c0_12] : memref<8x128xf32, #tpu.memory_space<vmem>>, vector<8x128xf32>
    tpu.vector_store %arg6[%c0_11, %c0_12], %12 {strides = array<i32>} : memref<8x128xf32, #tpu.memory_space<vmem>>, vector<8x128xf32>,
    return
  }
  func.func @transform_0(%arg0: i32) -> (i32, i32) {
    %c0_i32 = arith.constant 0 : i32
    %c0_i32_0 = arith.constant 0 : i32
    return %arg0, %c0_i32 : i32, i32
  }
  func.func @transform_1(%arg0: i32) -> (i32, i32) {
    %c0_i32 = arith.constant 0 : i32
    %c0_i32_0 = arith.constant 0 : i32
    %c0_i32_1 = arith.constant 0 : i32
    return %c0_i32, %c0_i32_0 : i32, i32
  }
  func.func @transform_2(%arg0: i32) -> (i32, i32) {
    %c0_i32 = arith.constant 0 : i32
    %c0_i32_0 = arith.constant 0 : i32
    %c0_i32_1 = arith.constant 0 : i32
    return %c0_i32, %c0_i32_0 : i32, i32
  }
  func.func @transform_3(%arg0: i32) -> (i32, i32) {
    %c0_i32 = arith.constant 0 : i32
    %c0_i32_0 = arith.constant 0 : i32
    %c0_i32_1 = arith.constant 0 : i32
    return %c0_i32, %c0_i32_0 : i32, i32
  }
  func.func @transform_4(%arg0: i32) -> (i32, i32) {
    %c0_i32 = arith.constant 0 : i32
    %c0_i32_0 = arith.constant 0 : i32
    %c0_i32_1 = arith.constant 0 : i32
    return %c0_i32, %c0_i32_0 : i32, i32
  }
  func.func @transform_5(%arg0: i32) -> (i32, i32) {
    %c0_i32 = arith.constant 0 : i32
    %c0_i32_0 = arith.constant 0 : i32
    return %arg0, %c0_i32 : i32, i32
  }
}

</mosaic_0001>

<bundles_post_ra>
// kernel: iris_model_forward.1
= control target key start
LH: loop header
LB: loop body
LE: loop exit
PB: predicated region body
PF: predicated region fallthrough
CT: control target
= control target key end

     0   :  { %10 = vsyncpa [#allocation3], 0  ;;  %s522_s0 = inlined_call_operand.vmem [shape: f32[8,128], index: 0, kind: input, shape index: {}]   ;;  %s523_s1 = inlined_call_operand.hbm [shape: f32[128,128], index: 1, kind: input, shape index: {}]   ;;  %s524_s2 = inlined_call_operand.vmem [shape: f32[1,128], index: 2, kind: input, shape index: {}]   ;;  %s525_s3 = inlined_call_operand.hbm [shape: f32[128,128], index: 3, kind: input, shape index: {}]   ;;  %s526_s4 = inlined_call_operand.vmem [shape: f32[1,128], index: 4, kind: input, shape index: {}]   ;;  %s527_s5 = inlined_call_operand.hbm [shape: f32[8,128], index: 5, kind: output, shape index: {}]  }
   0x1   :  { %11 = vsyncpa [#allocation6], 0 }
   0x2   :  { %12 = vsyncpa [#allocation4], 0  ;;  %s433_s18 = smov [#allocation2]  }
   0x3   :  { %s20_s19 = sshll.u32 %s433_s18, 4  ;;  %s21_s19 = int_to_ptr.vmem [resolvable:$true] %s20_s19 }
   0x4   :  { %s375_s20 = scalar_lea.vmem %s21_s19, 2048  ;;  %p380_p1 = scmp.lt.s32.totalorder %s21_s19, %s21_s19 }
   0x5   :  { %p376_p0 = scmp.ne.s32.totalorder %s21_s19, %s375_s20  ;;  %p381_p2 = scmp.lt.s32.totalorder %s375_s20, %s375_s20 }
   0x7   :  { %p382_p3 = por %p381_p2, %p380_p1 }
   0x9   :  { %p383_p4 = pnand %p382_p3, %p376_p0 }
   0xb   :  { %386 = shalt.err (!%p383_p4)
}
   0xc   :  { %s434_s21 = smov 128   ;;  %s435_s22 = smov 8  }
   0xd   :  { %26 = dma.hbm_to_vmem [thread:$0]  %s523_s1, 2048, %s21_s19, [#allocation3], %s434_s21, %s434_s21, %s435_s22  }
   0xe   :  { %s436_s25 = smov [#allocation5]  }
   0xf   :  { %s34_s26 = sshll.u32 %s436_s25, 4  ;;  %s35_s26 = int_to_ptr.vmem [resolvable:$true] %s34_s26 }
  0x10   :  { %s395_s27 = scalar_lea.vmem %s35_s26, 2048  ;;  %p400_p6 = scmp.lt.s32.totalorder %s35_s26, %s35_s26 }
  0x11   :  { %p396_p5 = scmp.ne.s32.totalorder %s35_s26, %s395_s27  ;;  %p401_p7 = scmp.lt.s32.totalorder %s395_s27, %s395_s27 }
  0x13   :  { %p402_p8 = por %p401_p7, %p400_p6 }
  0x15   :  { %p403_p9 = pnand %p402_p8, %p396_p5 }
  0x17   :  { %406 = shalt.err (!%p403_p9)
}
  0x18   :  { %40 = dma.hbm_to_vmem [thread:$0]  %s525_s3, 2048, %s35_s26, [#allocation6], %s434_s21, %s434_s21, %s435_s22  }
  0x19   :  { %427 = dma.done.wait [#allocation3], 2048  }
  0x1a   :  { %428 = vsyncadd [#allocation3], 4294965248 }
  0x1b   :  { %429 = dma.done.wait [#allocation6], 2048  }
  0x1c   :  { %430 = vsyncadd [#allocation6], 4294965248  ;;  %v437_v0 = vmov 0.0   ;;  %vm438_vm0 = vmmov 0   ;;  %v65_v1 = vld [vmem:[#allocation2 + $0x78] sm:$0xff]  ;;  %v64_v2 = vld [vmem:[#allocation2 + $0x70] sm:$0xff] }
  0x1d   :  { %290 = vmatprep.subr.mxu0 %v437_v0  ;;  %322 = vmatprep.mubr.msk.f32.mxu0 %vm438_vm0, %v437_v0  ;;  %v63_v3 = vld [vmem:[#allocation2 + $0x68] sm:$0xff]  ;;  %v62_v4 = vld [vmem:[#allocation2 + $0x60] sm:$0xff]  ;;  %v159_v5 = vld [vmem:[#allocation5 + $0x78] sm:$0xff]  ;;  %s439_s8 = smov [#allocation7]  }
  0x1e   :  { %325 = vmatprep.subr.mxu1 %v437_v0  ;;  %357 = vmatprep.mubr.msk.f32.mxu1 %vm438_vm0, %v437_v0  ;;  %v61_v6 = vld [vmem:[#allocation2 + $0x58] sm:$0xff]  ;;  %v158_v7 = vld [vmem:[#allocation5 + $0x70] sm:$0xff]  ;;  %v157_v8 = vld [vmem:[#allocation5 + $0x68] sm:$0xff]  ;;  %s244_s9 = sshll.u32 %s439_s8, 4  ;;  %s245_s9 = int_to_ptr.vmem [resolvable:$true] %s244_s9 }
  0x1f   :  { %291 = vmatpush3.msra.mxu0 %v65_v1  ;;  %326 = vmatpush3.msra.mxu1 %v159_v5  ;;  %v60_v9 = vld [vmem:[#allocation2 + $0x50] sm:$0xff]  ;;  %v156_v10 = vld [vmem:[#allocation5 + $0x60] sm:$0xff]  ;;  %v59_v11 = vld [vmem:[#allocation2 + $0x48] sm:$0xff]  ;;  %s407_s10 = scalar_lea.vmem %s245_s9, 128  ;;  %p412_p11 = scmp.lt.s32.totalorder %s245_s9, %s245_s9 }
  0x20   :  { %292 = vmatprep.subr.mxu0 %v437_v0  ;;  %327 = vmatprep.subr.mxu1 %v437_v0  ;;  %v155_v12 = vld [vmem:[#allocation5 + $0x58] sm:$0xff]  ;;  %v58_v13 = vld [vmem:[#allocation2 + $0x40] sm:$0xff]  ;;  %v154_v14 = vld [vmem:[#allocation5 + $0x50] sm:$0xff]  ;;  %p408_p10 = scmp.ne.s32.totalorder %s245_s9, %s407_s10  ;;  %p413_p12 = scmp.lt.s32.totalorder %s407_s10, %s407_s10 }
  0x21   :  { %293 = vmatpush3.msra.mxu0 %v64_v2  ;;  %328 = vmatpush3.msra.mxu1 %v158_v7  ;;  %v57_v15 = vld [vmem:[#allocation2 + $0x38] sm:$0xff]  ;;  %v153_v16 = vld [vmem:[#allocation5 + $0x48] sm:$0xff]  ;;  %v56_v17 = vld [vmem:[#allocation2 + $0x30] sm:$0xff] }
  0x22   :  { %294 = vmatprep.subr.mxu0 %v437_v0  ;;  %329 = vmatprep.subr.mxu1 %v437_v0  ;;  %v152_v18 = vld [vmem:[#allocation5 + $0x40] sm:$0xff]  ;;  %v55_v19 = vld [vmem:[#allocation2 + $0x28] sm:$0xff]  ;;  %v151_v20 = vld [vmem:[#allocation5 + $0x38] sm:$0xff]  ;;  %p414_p13 = por %p413_p12, %p412_p11 }
  0x23   :  { %295 = vmatpush3.msra.mxu0 %v63_v3  ;;  %330 = vmatpush3.msra.mxu1 %v157_v8  ;;  %v54_v21 = vld [vmem:[#allocation2 + $0x20] sm:$0xff]  ;;  %v150_v22 = vld [vmem:[#allocation5 + $0x30] sm:$0xff]  ;;  %v53_v23 = vld [vmem:[#allocation2 + $0x18] sm:$0xff] }
  0x24   :  { %296 = vmatprep.subr.mxu0 %v437_v0  ;;  %331 = vmatprep.subr.mxu1 %v437_v0  ;;  %v149_v24 = vld [vmem:[#allocation5 + $0x28] sm:$0xff]  ;;  %v52_v25 = vld [vmem:[#allocation2 + $0x10] sm:$0xff]  ;;  %v148_v26 = vld [vmem:[#allocation5 + $0x20] sm:$0xff]  ;;  %p415_p0 = pnand %p414_p13, %p408_p10 }
  0x25   :  { %297 = vmatpush3.msra.mxu0 %v62_v4  ;;  %332 = vmatpush3.msra.mxu1 %v156_v10  ;;  %v51_v27 = vld [vmem:[#allocation2 + $0x8] sm:$0xff]  ;;  %v147_v28 = vld [vmem:[#allocation5 + $0x18] sm:$0xff]  ;;  %v50_v29 = vld [vmem:[#allocation2] sm:$0xff] }
  0x26   :  { %298 = vmatprep.subr.mxu0 %v437_v0  ;;  %333 = vmatprep.subr.mxu1 %v437_v0  ;;  %v49_v30 = vld [vmem:[%s522_s0] sm:$0xff]  ;;  %v146_v31 = vld [vmem:[#allocation5 + $0x10] sm:$0xff]  ;;  %v145_v32 = vld [vmem:[#allocation5 + $0x8] sm:$0xff] }
  0x27   :  { %299 = vmatpush3.msra.mxu0 %v61_v6  ;;  %334 = vmatpush3.msra.mxu1 %v155_v12  ;;  %v144_v33 = vld [vmem:[#allocation5] sm:$0xff] }
  0x28   :  { %300 = vmatprep.subr.mxu0 %v437_v0  ;;  %335 = vmatprep.subr.mxu1 %v437_v0  ;;  %v254_v34 = vld [vmem:[%s524_s2] ss:$0 sm:$0xff] }
  0x29   :  { %301 = vmatpush3.msra.mxu0 %v60_v9  ;;  %336 = vmatpush3.msra.mxu1 %v154_v14  ;;  %v255_v39 = vld [vmem:[%s526_s4] ss:$0 sm:$0xff] }
  0x2a   :  { %302 = vmatprep.subr.mxu0 %v437_v0  ;;  %337 = vmatprep.subr.mxu1 %v437_v0 }
  0x2b   :  { %303 = vmatpush3.msra.mxu0 %v59_v11  ;;  %338 = vmatpush3.msra.mxu1 %v153_v16 }
  0x2c   :  { %304 = vmatprep.subr.mxu0 %v437_v0  ;;  %339 = vmatprep.subr.mxu1 %v437_v0 }
  0x2d   :  { %305 = vmatpush3.msra.mxu0 %v58_v13  ;;  %340 = vmatpush3.msra.mxu1 %v152_v18 }
  0x2e   :  { %306 = vmatprep.subr.mxu0 %v437_v0  ;;  %341 = vmatprep.subr.mxu1 %v437_v0 }
  0x2f   :  { %307 = vmatpush3.msra.mxu0 %v57_v15  ;;  %342 = vmatpush3.msra.mxu1 %v151_v20 }
  0x30   :  { %308 = vmatprep.subr.mxu0 %v437_v0  ;;  %343 = vmatprep.subr.mxu1 %v437_v0 }
  0x31   :  { %309 = vmatpush3.msra.mxu0 %v56_v17  ;;  %344 = vmatpush3.msra.mxu1 %v150_v22 }
  0x32   :  { %310 = vmatprep.subr.mxu0 %v437_v0  ;;  %345 = vmatprep.subr.mxu1 %v437_v0 }
  0x33   :  { %311 = vmatpush3.msra.mxu0 %v55_v19  ;;  %346 = vmatpush3.msra.mxu1 %v149_v24 }
  0x34   :  { %312 = vmatprep.subr.mxu0 %v437_v0  ;;  %347 = vmatprep.subr.mxu1 %v437_v0 }
  0x35   :  { %313 = vmatpush3.msra.mxu0 %v54_v21  ;;  %348 = vmatpush3.msra.mxu1 %v148_v26 }
  0x36   :  { %314 = vmatprep.subr.mxu0 %v437_v0  ;;  %349 = vmatprep.subr.mxu1 %v437_v0 }
  0x37   :  { %315 = vmatpush3.msra.mxu0 %v53_v23  ;;  %350 = vmatpush3.msra.mxu1 %v147_v28 }
  0x38   :  { %316 = vmatprep.subr.mxu0 %v437_v0  ;;  %351 = vmatprep.subr.mxu1 %v437_v0 }
  0x39   :  { %317 = vmatpush3.msra.mxu0 %v52_v25  ;;  %352 = vmatpush3.msra.mxu1 %v146_v31 }
  0x3a   :  { %318 = vmatprep.subr.mxu0 %v437_v0  ;;  %353 = vmatprep.subr.mxu1 %v437_v0 }
  0x3b   :  { %319 = vmatpush3.msra.mxu0 %v51_v27  ;;  %354 = vmatpush3.msra.mxu1 %v145_v32 }
  0x3c   :  { %320 = vmatprep.subr.mxu0 %v437_v0  ;;  %355 = vmatprep.subr.mxu1 %v437_v0 }
  0x3d   :  { %321 = vmatpush3.msra.mxu0 %v50_v29  ;;  %356 = vmatpush3.msra.mxu1 %v144_v33 }
  0x3e   :  { %323 = vmatmul.mubr.f32.vlgmr.msra.gmra.mxu0 %v49_v30 }
  0xfe   :  { %v139_v35 = vpop.f32.mrf.mxu0 }
  0xff   :  { %v140_v36 = vadd.f32 %v254_v34, %v139_v35 }
 0x100   :  { %v324_v37 = vpop.f32.mrf.mxu0 }
 0x101   :  { %v143_v38 = vmax.f32 %v140_v36, 0.0 }
 0x103   :  { %358 = vmatmul.mubr.f32.vlgmr.msra.gmra.mxu1 %v143_v38 }
 0x1c3   :  { %v233_v40 = vpop.f32.mrf.mxu1 }
 0x1c4   :  { %v234_v41 = vadd.f32 %v255_v39, %v233_v40 }
 0x1c5   :  { %v359_v42 = vpop.f32.mrf.mxu1 }
 0x1c6   :  { %237 = vst [vmem:[#allocation7] sm:$0xff] %v234_v41 }
 0x1c7   :  { %418 = shalt.err (!%p415_p0)
}
 0x1c8   :  { %247 = dma.vmem_to_hbm [thread:$0]  %s245_s9, 128, %s527_s5, [#allocation4]  }
 0x1c9   :  { %431 = dma.done.wait [#allocation4], 128  }
 0x1ca   :  { %432 = vsyncadd [#allocation4], 4294967168 }
 0x1cb   :  { %251 = vsyncpa [#allocation3], 1 }
 0x1cc   :  { %252 = vsyncpa [#allocation6], 1 }
 0x1cd   :  { %253 = vsyncpa [#allocation4], 1 }

</bundles_post_ra>
